<compile_context>
chip_gen: v7x
topology: tpu7x:2x2x1
jax: 0.10.0
libtpu: 0.0.40
codegen_flags: <defaults>
</compile_context>

<pallas_src>
import jax
import jax.numpy as jnp
from jax.experimental import pallas as pl
from jax.experimental.pallas import tpu as pltpu

_OUT_PAD = 128  # lane-dense output width (true output dim is 2)


def _mlp_kernel(x_ref, w1_ref, b1_ref, w2p_ref, o_ref):
    # x_ref: (TB, 4), w1_ref: (4, 16), b1_ref: (1, 16), w2p_ref: (16, 128)
    # o_ref: (TB, 128) -- lane-dense padded output tile.
    x = x_ref[...]
    h = jnp.dot(x, w1_ref[...], preferred_element_type=jnp.float32)
    h = jnp.maximum(h + b1_ref[...], 0.0)          # bias broadcast + relu
    o = jnp.dot(h, w2p_ref[...], preferred_element_type=jnp.float32)
    o_ref[...] = o.astype(o_ref.dtype)             # unmasked, lane-dense store


def neural_network_forward(x, w1, b1, w2, *, tb=None):
    """x: (B, 4) f32; w1: (4, 16); b1: (16,); w2: (16, 2). Returns (B, 2)."""
    B, F = x.shape
    H = w1.shape[1]
    O = w2.shape[1]

    # Lane-dense output: pad W2's output axis to 128 lanes with zeros.
    w2p = jnp.zeros((H, _OUT_PAD), dtype=w2.dtype).at[:, :O].set(w2)
    b1_2d = b1.reshape(1, H)

    # Batch tile: sublane-aligned (multiple of 8), large enough to amortize
    # per-grid-step overhead, capped so tiles stay tiny in VMEM
    # (TB=1024 -> x tile ~512 KiB + out tile ~512 KiB, double-buffered ~2 MiB,
    # well inside the v7x 32 MiB scoped default).
    if tb is None:
        tb = max(8, min(1024, ((B + 7) // 8) * 8))
    b_pad = ((B + tb - 1) // tb) * tb
    if b_pad != B:
        x = jnp.pad(x, ((0, b_pad - B), (0, 0)))
    grid = (b_pad // tb,)

    out_padded = pl.pallas_call(
        _mlp_kernel,
        out_shape=jax.ShapeDtypeStruct((b_pad, _OUT_PAD), x.dtype),
        grid=grid,
        in_specs=[
            pl.BlockSpec((tb, F), lambda i: (i, 0)),       # batch-tiled X
            pl.BlockSpec((F, H), lambda i: (0, 0)),        # W1 resident
            pl.BlockSpec((1, H), lambda i: (0, 0)),        # b1 resident
            pl.BlockSpec((H, _OUT_PAD), lambda i: (0, 0)), # padded W2 resident
        ],
        out_specs=pl.BlockSpec((tb, _OUT_PAD), lambda i: (i, 0)),
        compiler_params=pltpu.CompilerParams(
            dimension_semantics=("parallel",),  # megacore: split batch tiles
        ),
    )(x, w1, b1_2d, w2p)

    return out_padded[:B, :O]


def reference_forward(x, w1, b1, w2):
    h = jnp.maximum(x @ w1 + b1, 0.0)
    return h @ w2


if __name__ == "__main__":
    key = jax.random.PRNGKey(0)
    k_x, k_w1, k_b1, k_w2 = jax.random.split(key, 4)

    input_dim, hidden_dim, output_dim = 4, 16, 2
    batch = 8

    # Deterministic synthetic parameters (PyTorch-style uniform init bounds).
    x = jax.random.normal(k_x, (batch, input_dim), dtype=jnp.float32)
    bound1 = 1.0 / jnp.sqrt(input_dim)
    w1 = jax.random.uniform(k_w1, (input_dim, hidden_dim),
                            minval=-bound1, maxval=bound1, dtype=jnp.float32)
    b1 = jax.random.uniform(k_b1, (hidden_dim,),
                            minval=-bound1, maxval=bound1, dtype=jnp.float32)
    bound2 = 1.0 / jnp.sqrt(hidden_dim)
    w2 = jax.random.uniform(k_w2, (hidden_dim, output_dim),
                            minval=-bound2, maxval=bound2, dtype=jnp.float32)

    # Small-batch case (grid of 1 tile).
    out = jax.block_until_ready(neural_network_forward(x, w1, b1, w2))
    ref = reference_forward(x, w1, b1, w2)
    assert out.shape == (batch, output_dim)
    assert jnp.allclose(out, ref, atol=1e-5, rtol=1e-5)

    # Multi-tile / padded-batch case (exercises batch tiling + parallel axis).
    big_batch = 300
    xb = jax.random.normal(jax.random.PRNGKey(1), (big_batch, input_dim),
                           dtype=jnp.float32)
    out_b = jax.block_until_ready(
        neural_network_forward(xb, w1, b1, w2, tb=128))
    ref_b = reference_forward(xb, w1, b1, w2)
    assert out_b.shape == (big_batch, output_dim)
    assert jnp.allclose(out_b, ref_b, atol=1e-5, rtol=1e-5)

    print("KERNEL_OK")
</pallas_src>

<mosaic_0001>
module attributes {stable_mosaic.version = 11 : i64} {
  func.func @_mlp_kernel(%arg0: i32, %arg1: memref<8x4xf32, #tpu.memory_space<vmem>>, %arg2: memref<4x16xf32, #tpu.memory_space<vmem>>, %arg3: memref<1x16xf32, #tpu.memory_space<vmem>>, %arg4: memref<16x128xf32, #tpu.memory_space<vmem>>, %arg5: memref<8x128xf32, #tpu.memory_space<vmem>>) attributes {dimension_semantics = [#tpu.dimension_semantics<parallel>], iteration_bounds = array<i64: 1>, scalar_prefetch = 0 : i64, scratch_operands = 0 : i64, tpu.core_type = #tpu.core_type<tc>, window_params = [{transform_indices = @transform_0, window_bounds = array<i64: 8, 4>}, {pipeline_mode = #tpu.pipeline_mode<synchronous>, transform_indices = @transform_1, window_bounds = array<i64: 4, 16>}, {pipeline_mode = #tpu.pipeline_mode<synchronous>, transform_indices = @transform_2, window_bounds = array<i64: 1, 16>}, {pipeline_mode = #tpu.pipeline_mode<synchronous>, transform_indices = @transform_3, window_bounds = array<i64: 16, 128>}, {transform_indices = @transform_4, window_bounds = array<i64: 8, 128>}]} {
    %c0 = arith.constant 0 : index
    %c0_0 = arith.constant 0 : index
    %0 = vector.load %arg1[%c0, %c0_0] : memref<8x4xf32, #tpu.memory_space<vmem>>, vector<8x4xf32>
    %c0_1 = arith.constant 0 : index
    %c0_2 = arith.constant 0 : index
    %1 = vector.load %arg2[%c0_1, %c0_2] : memref<4x16xf32, #tpu.memory_space<vmem>>, vector<4x16xf32>
    %cst = arith.constant dense<0.000000e+00> : vector<8x16xf32>
    %2 = tpu.matmul %0, %1, %cst {dimension_numbers = #tpu.dot_dimension_numbers<[1], [0], [0], [1], [0, 0, 1, 1], [], []>} : vector<8x4xf32>, vector<4x16xf32>, vector<8x16xf32> -> vector<8x16xf32>
    %c0_3 = arith.constant 0 : index
    %c0_4 = arith.constant 0 : index
    %3 = vector.load %arg3[%c0_3, %c0_4] : memref<1x16xf32, #tpu.memory_space<vmem>>, vector<1x16xf32>
    %4 = vector.broadcast %3 : vector<1x16xf32> to vector<8x16xf32>
    %5 = arith.addf %2, %4 : vector<8x16xf32>
    %cst_5 = arith.constant 0.000000e+00 : f32
    %6 = vector.broadcast %cst_5 : f32 to vector<8x16xf32>
    %7 = arith.maximumf %5, %6 : vector<8x16xf32>
    %c0_6 = arith.constant 0 : index
    %c0_7 = arith.constant 0 : index
    %8 = vector.load %arg4[%c0_6, %c0_7] : memref<16x128xf32, #tpu.memory_space<vmem>>, vector<16x128xf32>
    %cst_8 = arith.constant dense<0.000000e+00> : vector<8x128xf32>
    %9 = tpu.matmul %7, %8, %cst_8 {dimension_numbers = #tpu.dot_dimension_numbers<[1], [0], [0], [1], [0, 0, 1, 1], [], []>} : vector<8x16xf32>, vector<16x128xf32>, vector<8x128xf32> -> vector<8x128xf32>
    %c0_9 = arith.constant 0 : index
    %c0_10 = arith.constant 0 : index
    %10 = vector.load %arg5[%c0_9, %c0_10] : memref<8x128xf32, #tpu.memory_space<vmem>>, vector<8x128xf32>
    tpu.vector_store %arg5[%c0_9, %c0_10], %9 {strides = array<i32>} : memref<8x128xf32, #tpu.memory_space<vmem>>, vector<8x128xf32>,
    return
  }
  func.func @transform_0(%arg0: i32) -> (i32, i32) {
    %c0_i32 = arith.constant 0 : i32
    %c0_i32_0 = arith.constant 0 : i32
    return %arg0, %c0_i32 : i32, i32
  }
  func.func @transform_1(%arg0: i32) -> (i32, i32) {
    %c0_i32 = arith.constant 0 : i32
    %c0_i32_0 = arith.constant 0 : i32
    %c0_i32_1 = arith.constant 0 : i32
    return %c0_i32, %c0_i32_0 : i32, i32
  }
  func.func @transform_2(%arg0: i32) -> (i32, i32) {
    %c0_i32 = arith.constant 0 : i32
    %c0_i32_0 = arith.constant 0 : i32
    %c0_i32_1 = arith.constant 0 : i32
    return %c0_i32, %c0_i32_0 : i32, i32
  }
  func.func @transform_3(%arg0: i32) -> (i32, i32) {
    %c0_i32 = arith.constant 0 : i32
    %c0_i32_0 = arith.constant 0 : i32
    %c0_i32_1 = arith.constant 0 : i32
    return %c0_i32, %c0_i32_0 : i32, i32
  }
  func.func @transform_4(%arg0: i32) -> (i32, i32) {
    %c0_i32 = arith.constant 0 : i32
    %c0_i32_0 = arith.constant 0 : i32
    return %arg0, %c0_i32 : i32, i32
  }
}

</mosaic_0001>

<bundles_post_ra>
// kernel: tpu_custom_call.1
= control target key start
LH: loop header
LB: loop body
LE: loop exit
PB: predicated region body
PF: predicated region fallthrough
CT: control target
= control target key end

     0   :  { %vm31_vm0 = vcmask 1043456   ;;  %v249_v2 = vmov 0.0   ;;  %vm250_vm1 = vmmov 0   ;;  %vm27_vm2 = vcmask 31744   ;;  %s305_s0 = inlined_call_operand.vmem [shape: f32[8,4], index: 0, kind: input, shape index: {}]   ;;  %s306_s1 = inlined_call_operand.vmem [shape: f32[4,16], index: 1, kind: input, shape index: {}]   ;;  %s307_s2 = inlined_call_operand.vmem [shape: f32[1,16], index: 2, kind: input, shape index: {}]   ;;  %s308_s3 = inlined_call_operand.vmem [shape: f32[16,128], index: 3, kind: input, shape index: {}]   ;;  %s309_s4 = inlined_call_operand.hbm [shape: f32[8,128], index: 4, kind: output, shape index: {}]  }
   0x1   :  { %v19_v0 = vld [vmem:[%s306_s1] sm:$0xf]  ;;  %206 = vmatprep.subr.mxu0 %v249_v2  ;;  %208 = vmatprep.mubr.msk.f32.mxu0 %vm250_vm1, %v249_v2 }
   0x2   :  { %v18_v1 = vld [vmem:[%s305_s0] sm:$0xff] }
   0x3   :  { %9 = vsyncpa [#allocation3], 0  ;;  %207 = vmatpush3.msk.msra.mxu0 %vm31_vm0, %v19_v0  ;;  %215 = vmatprep.mubr.msk.f32.mxu1 %vm250_vm1, %v249_v2  ;;  %v106_v3 = vld [vmem:[%s308_s3] sm:$0xff]  ;;  %v107_v4 = vld [vmem:[%s308_s3 + $0x8] sm:$0xff]  ;;  %v251_v6 = vmov 0.0|0.0   ;;  %vm108_vm3 = vcmask 130048  }
   0x4   :  { %209 = vmatmul.mubr.msk.f32.vlgmr.msra.gmra.mrb[0].mxu0 %vm27_vm2, %v18_v1  ;;  %v219_v5 = vpack.c.bf16 %v107_v4, %v106_v3  ;;  %218 = vmatprep.subr.bf16.mxu1 %v251_v6  ;;  %v197_v7 = vld [vmem:[%s307_s2] ss:$0 sm:$0xff]  ;;  %s252_s23 = smov [#allocation2]  }
   0x5   :  { %s189_s24 = sshll.u32 %s252_s23, 4  ;;  %s190_s24 = int_to_ptr.vmem [resolvable:$true] %s189_s24 }
   0x6   :  { %220 = vmatpush3.bf16.msra.mxu1 %v219_v5  ;;  %s225_s3 = scalar_lea.vmem %s190_s24, 128  ;;  %p230_p1 = scmp.lt.s32.totalorder %s190_s24, %s190_s24 }
   0x7   :  { %p226_p0 = scmp.ne.s32.totalorder %s190_s24, %s225_s3  ;;  %p231_p2 = scmp.lt.s32.totalorder %s225_s3, %s225_s3 }
   0x9   :  { %p232_p3 = por %p231_p2, %p230_p1 }
   0xb   :  { %p233_p4 = pnand %p232_p3, %p226_p0 }
  0xd7   :  { %v101_v8 = vpop.f32.mrb[0].mxu0 }
  0xd8   :  { %v102_v9 = vadd.f32 %v197_v7, %v101_v8  ;;  %v210_v10 = vpop.f32.mrb[1].mxu0 }
  0xda   :  { %v105_v11 = vmax.f32 %v102_v9, 0.0 }
  0xdc   :  { %216 = vmatmul.mubr.msk.f32.vlgmr.msra.gmra.mrb[0].mxu1 %vm108_vm3, %v105_v11 }
 0x1af   :  { %v178_v12 = vpop.f32.mrb[0].mxu1 }
 0x1b0   :  { %182 = vst [vmem:[#allocation2] sm:$0xff] %v178_v12  ;;  %v217_v13 = vpop.f32.mrb[1].mxu1 }
 0x1b1   :  { %236 = shalt.err (!%p233_p4)
}
 0x1b2   :  { %s237_s26 = scalar_lea.hbm %s309_s4, 128 }
 0x1b3   :  { %p238_p5 = scmp.ne.s32.totalorder %s309_s4, %s237_s26  ;;  %p241_p6 = scmp.lt.u32.totalorder %s237_s26, %s309_s4 }
 0x1b5   :  { %p243_p7 = pnand %p241_p6, %p238_p5 }
 0x1b7   :  { %246 = shalt.err (!%p243_p7)
}
 0x1b8   :  { %192 = dma.vmem_to_hbm [thread:$0]  %s190_s24, 128, %s309_s4, [#allocation3]  }
 0x1b9   :  { %247 = dma.done.wait [#allocation3], 128  }
 0x1ba   :  { %248 = vsyncadd [#allocation3], 4294967168 }
 0x1bb   :  { %196 = vsyncpa [#allocation3], 1 }

</bundles_post_ra>
